<compile_context>
chip_gen: v5e
topology: v5e:2x2
jax: 0.10.0
libtpu: 0.0.40
codegen_flags: <defaults>
</compile_context>

<pallas_src>
import math

import jax
import jax.numpy as jnp
from jax.experimental import pallas as pl
from jax.experimental.pallas import tpu as pltpu


def _linear_kernel(wT_ref, x_ref, b_ref, o_ref, acc_ref):
    # wT_ref: (TK, TN)   weight tile (already transposed: in_dim x out_dim)
    # x_ref : (1, TK)    input slice
    # b_ref : (1, TN)    bias tile (f32)
    # o_ref : (1, TN)    output tile
    # acc_ref: (1, TN)   f32 accumulator, resident across the K grid axis
    k = pl.program_id(1)

    @pl.when(k == 0)
    def _():
        acc_ref[...] = jnp.zeros_like(acc_ref)

    acc_ref[...] += jnp.dot(
        x_ref[...], wT_ref[...], preferred_element_type=jnp.float32
    )

    @pl.when(k == pl.num_programs(1) - 1)
    def _():
        o_ref[...] = (acc_ref[...] + b_ref[...]).astype(o_ref.dtype)


def _round_up(n, m):
    return ((n + m - 1) // m) * m


def linear_forward(weights, biases, x, *, tn=512, tk=2048, compute_dtype=None):
    """Pallas equivalent of `weights.mv(x) + biases`.

    weights: (out_dim, in_dim) f32
    biases : (out_dim,)        f32
    x      : (in_dim,)         f32
    tn, tk : lane-dense tile sizes (multiples of 128) for out_dim / in_dim
    compute_dtype: optional narrower dtype (e.g. jnp.bfloat16) for W / x;
                   accumulation stays f32.
    returns: (out_dim,) f32
    """
    out_dim, in_dim = weights.shape

    # Pad to lane-dense (multiple-of-128) sizes, then to a whole number of tiles.
    n_pad = _round_up(out_dim, 128)
    k_pad = _round_up(in_dim, 128)
    tn = min(tn, n_pad)
    tk = min(tk, k_pad)
    n_pad = _round_up(n_pad, tn)
    k_pad = _round_up(k_pad, tk)

    w_dtype = compute_dtype if compute_dtype is not None else weights.dtype
    x_dtype = compute_dtype if compute_dtype is not None else x.dtype

    # One-time layout prep outside the kernel (zero padding keeps results exact).
    wT = jnp.zeros((k_pad, n_pad), w_dtype).at[:in_dim, :out_dim].set(
        weights.T.astype(w_dtype)
    )
    x_row = jnp.zeros((1, k_pad), x_dtype).at[0, :in_dim].set(x.astype(x_dtype))
    b_row = jnp.zeros((1, n_pad), jnp.float32).at[0, :out_dim].set(
        biases.astype(jnp.float32)
    )

    grid = (n_pad // tn, k_pad // tk)

    out = pl.pallas_call(
        _linear_kernel,
        out_shape=jax.ShapeDtypeStruct((1, n_pad), jnp.float32),
        grid=grid,
        in_specs=[
            pl.BlockSpec((tk, tn), lambda n, k: (k, n)),   # W^T tile
            pl.BlockSpec((1, tk), lambda n, k: (0, k)),    # x slice
            pl.BlockSpec((1, tn), lambda n, k: (0, n)),    # bias tile
        ],
        out_specs=pl.BlockSpec((1, tn), lambda n, k: (0, n)),
        scratch_shapes=[pltpu.VMEM((1, tn), jnp.float32)],
        compiler_params=pltpu.CompilerParams(
            dimension_semantics=("parallel", "arbitrary"),
            vmem_limit_bytes=32 * 1024 * 1024,
        ),
    )(wT, x_row, b_row)

    return out[0, :out_dim]


def init_linear_params(key, in_dim, out_dim):
    """Deterministic init matching torch uniform_(-std, std), std = 1/sqrt(in_dim)."""
    std = 1.0 / math.sqrt(in_dim)
    kw, kb = jax.random.split(key)
    weights = jax.random.uniform(
        kw, (out_dim, in_dim), dtype=jnp.float32, minval=-std, maxval=std
    )
    biases = jax.random.uniform(
        kb, (out_dim,), dtype=jnp.float32, minval=-std, maxval=std
    )
    return weights, biases


if __name__ == "__main__":
    key = jax.random.PRNGKey(0)

    # --- Test 1: non-multiple-of-128 dims, small tiles -> multi-step (N,K) grid,
    #             exercising padding, accumulation across K, and pipelining.
    in_dim, out_dim = 384, 200
    kparam, kx, key = jax.random.split(key, 3)
    weights, biases = init_linear_params(kparam, in_dim, out_dim)
    x = jax.random.normal(kx, (in_dim,), dtype=jnp.float32)

    y = linear_forward(weights, biases, x, tn=128, tk=128)
    jax.block_until_ready(y)
    y_ref = weights @ x + biases
    assert y.shape == (out_dim,)
    assert jnp.allclose(y, y_ref, atol=1e-5, rtol=1e-5)

    # --- Test 2: tiny layer with default tiles (single-tile grid), f32.
    in_dim2, out_dim2 = 32, 16
    kparam2, kx2, key = jax.random.split(key, 3)
    weights2, biases2 = init_linear_params(kparam2, in_dim2, out_dim2)
    x2 = jax.random.normal(kx2, (in_dim2,), dtype=jnp.float32)

    y2 = linear_forward(weights2, biases2, x2)
    jax.block_until_ready(y2)
    y2_ref = weights2 @ x2 + biases2
    assert y2.shape == (out_dim2,)
    assert jnp.allclose(y2, y2_ref, atol=1e-5, rtol=1e-5)

    # --- Test 3: bf16 weight/input streaming (f32 accumulation), looser tolerance.
    y3 = linear_forward(weights, biases, x, tn=128, tk=128,
                        compute_dtype=jnp.bfloat16)
    jax.block_until_ready(y3)
    assert jnp.allclose(y3, y_ref, atol=5e-2, rtol=5e-2)

    print("KERNEL_OK")
</pallas_src>

<mosaic_0001>
module attributes {stable_mosaic.version = 11 : i64} {
  func.func @_linear_kernel(%arg0: i32, %arg1: i32, %arg2: memref<128x128xf32, #tpu.memory_space<vmem>>, %arg3: memref<1x128xf32, #tpu.memory_space<vmem>>, %arg4: memref<1x128xf32, #tpu.memory_space<vmem>>, %arg5: memref<1x128xf32, #tpu.memory_space<vmem>>, %arg6: memref<1x128xf32, #tpu.memory_space<vmem>>) attributes {dimension_semantics = [#tpu.dimension_semantics<parallel>, #tpu.dimension_semantics<arbitrary>], iteration_bounds = array<i64: 2, 3>, scalar_prefetch = 0 : i64, scratch_operands = 1 : i64, tpu.core_type = #tpu.core_type<tc>, window_params = [{transform_indices = @transform_0, window_bounds = array<i64: 128, 128>}, {transform_indices = @transform_1, window_bounds = array<i64: 1, 128>}, {transform_indices = @transform_2, window_bounds = array<i64: 1, 128>}, {transform_indices = @transform_3, window_bounds = array<i64: 1, 128>}]} {
    %c0_i32 = arith.constant 0 : i32
    %0 = arith.cmpi eq, %arg1, %c0_i32 : i32
    %1 = arith.extui %0 : i1 to i32
    %c0_i32_0 = arith.constant 0 : i32
    %2 = arith.cmpi ne, %1, %c0_i32_0 : i32
    scf.if %2 {
      %cst_9 = arith.constant 0.000000e+00 : f32
      %12 = vector.broadcast %cst_9 : f32 to vector<1x128xf32>
      %c0_10 = arith.constant 0 : index
      %c0_11 = arith.constant 0 : index
      %13 = vector.load %arg6[%c0_10, %c0_11] : memref<1x128xf32, #tpu.memory_space<vmem>>, vector<1x128xf32>
      tpu.vector_store %arg6[%c0_10, %c0_11], %12 {strides = array<i32>} : memref<1x128xf32, #tpu.memory_space<vmem>>, vector<1x128xf32>,
    } else {
    }
    %c0 = arith.constant 0 : index
    %c0_1 = arith.constant 0 : index
    %3 = vector.load %arg6[%c0, %c0_1] : memref<1x128xf32, #tpu.memory_space<vmem>>, vector<1x128xf32>
    %c0_2 = arith.constant 0 : index
    %c0_3 = arith.constant 0 : index
    %4 = vector.load %arg3[%c0_2, %c0_3] : memref<1x128xf32, #tpu.memory_space<vmem>>, vector<1x128xf32>
    %c0_4 = arith.constant 0 : index
    %c0_5 = arith.constant 0 : index
    %5 = vector.load %arg2[%c0_4, %c0_5] : memref<128x128xf32, #tpu.memory_space<vmem>>, vector<128x128xf32>
    %cst = arith.constant dense<0.000000e+00> : vector<1x128xf32>
    %6 = tpu.matmul %4, %5, %cst {dimension_numbers = #tpu.dot_dimension_numbers<[1], [0], [0], [1], [0, 0, 1, 1], [], []>} : vector<1x128xf32>, vector<128x128xf32>, vector<1x128xf32> -> vector<1x128xf32>
    %7 = arith.addf %3, %6 : vector<1x128xf32>
    %c0_6 = arith.constant 0 : index
    %c0_7 = arith.constant 0 : index
    %8 = vector.load %arg6[%c0_6, %c0_7] : memref<1x128xf32, #tpu.memory_space<vmem>>, vector<1x128xf32>
    tpu.vector_store %arg6[%c0_6, %c0_7], %7 {strides = array<i32>} : memref<1x128xf32, #tpu.memory_space<vmem>>, vector<1x128xf32>,
    %c2_i32 = arith.constant 2 : i32
    %9 = arith.cmpi eq, %arg1, %c2_i32 : i32
    %10 = arith.extui %9 : i1 to i32
    %c0_i32_8 = arith.constant 0 : i32
    %11 = arith.cmpi ne, %10, %c0_i32_8 : i32
    scf.if %11 {
      %c0_9 = arith.constant 0 : index
      %c0_10 = arith.constant 0 : index
      %12 = vector.load %arg6[%c0_9, %c0_10] : memref<1x128xf32, #tpu.memory_space<vmem>>, vector<1x128xf32>
      %c0_11 = arith.constant 0 : index
      %c0_12 = arith.constant 0 : index
      %13 = vector.load %arg4[%c0_11, %c0_12] : memref<1x128xf32, #tpu.memory_space<vmem>>, vector<1x128xf32>
      %14 = arith.addf %12, %13 : vector<1x128xf32>
      %c0_13 = arith.constant 0 : index
      %c0_14 = arith.constant 0 : index
      %15 = vector.load %arg5[%c0_13, %c0_14] : memref<1x128xf32, #tpu.memory_space<vmem>>, vector<1x128xf32>
      tpu.vector_store %arg5[%c0_13, %c0_14], %14 {strides = array<i32>} : memref<1x128xf32, #tpu.memory_space<vmem>>, vector<1x128xf32>,
    } else {
    }
    return
  }
  func.func @transform_0(%arg0: i32, %arg1: i32) -> (i32, i32) {
    %c0_i32 = arith.constant 0 : i32
    return %arg1, %arg0 : i32, i32
  }
  func.func @transform_1(%arg0: i32, %arg1: i32) -> (i32, i32) {
    %c0_i32 = arith.constant 0 : i32
    %c0_i32_0 = arith.constant 0 : i32
    return %c0_i32, %arg1 : i32, i32
  }
  func.func @transform_2(%arg0: i32, %arg1: i32) -> (i32, i32) {
    %c0_i32 = arith.constant 0 : i32
    %c0_i32_0 = arith.constant 0 : i32
    return %c0_i32, %arg0 : i32, i32
  }
  func.func @transform_3(%arg0: i32, %arg1: i32) -> (i32, i32) {
    %c0_i32 = arith.constant 0 : i32
    %c0_i32_0 = arith.constant 0 : i32
    return %c0_i32, %arg0 : i32, i32
  }
}

</mosaic_0001>

<bundles_post_ra>
// kernel: tpu_custom_call.1
= control target key start
LH: loop header
LB: loop body
LE: loop exit
PB: predicated region body
PF: predicated region fallthrough
CT: control target
= control target key end

     0   :  { %s1196_s0 = inlined_call_operand.hbm [shape: f32[384,256], index: 0, kind: input, shape index: {}]   ;;  %s1197_s1 = inlined_call_operand.hbm [shape: f32[1,384], index: 1, kind: input, shape index: {}]   ;;  %s1198_s2 = inlined_call_operand.hbm [shape: f32[1,256], index: 2, kind: input, shape index: {}]   ;;  %s1199_s3 = inlined_call_operand.hbm [shape: f32[1,256], index: 3, kind: output, shape index: {}]  }
   0x1   :  { %1207 = sst [smem:[#allocation21_spill]] %s1197_s1 }
   0x2   :  { %1208 = sst [smem:[#allocation22_spill]] %s1199_s3 }
   0x3   :  { %8 = vsyncpa [#allocation4], 0 }
   0x4   :  { %10 = vsyncpa [#allocation4 + $0x1], 0 }
   0x5   :  { %11 = vsyncpa [#allocation7], 0 }
   0x6   :  { %13 = vsyncpa [#allocation7 + $0x1], 0 }
   0x7   :  { %14 = vsyncpa [#allocation5], 0 }
   0x8   :  { %16 = vsyncpa [#allocation5 + $0x1], 0  ;;  %s879_s12 = smov 0   ;;  %s881_s13 = smov 0  }
   0x9   :  { %s883_s14 = smov 0   ;;  %s885_s15 = smov 0  }
   0xa   :  { %s887_s16 = smov 0   ;;  %s889_s17 = smov 0  }
   0xb   :  { %s891_s18 = smov 0   ;;  %s893_s19 = smov 0  }
   0xc   :  { %s895_s20 = smov 0   ;;  %s897_s21 = smov 0  }
   0xd   :  { %s899_s22 = smov 0   ;;  %s901_s23 = smov 0  }
   0xe   :  { %s903_s24 = smov 0   ;;  %s905_s25 = smov 0  }
   0xf LB: > { %1209 = sst [smem:[#allocation14_spill]] %s821_s17  ;;  %s948_s26 = sadd.s32 4294967295, %s853_s25   ;;  %s853_s25 = sphi %s905_s25, %s22_s25   ;;  %s849_s24 = sphi %s903_s24, %s1244_s24   ;;  %s845_s23 = sphi %s901_s23, %s1234_s23   ;;  %s841_s22 = sphi %s899_s22, %s1243_s22   ;;  %s837_s21 = sphi %s897_s21, %s1233_s21   ;;  %s833_s20 = sphi %s895_s20, %s1232_s20   ;;  %s829_s19 = sphi %s893_s19, %s1242_s19   ;;  %s825_s18 = sphi %s891_s18, %s1241_s18   ;;  %s821_s17 = sphi %s889_s17, %s1230_s17   ;;  %s817_s16 = sphi %s887_s16, %s1240_s16   ;;  %s813_s15 = sphi %s885_s15, %s1239_s15   ;;  %s809_s14 = sphi %s883_s14, %s1238_s14   ;;  %s805_s13 = sphi %s881_s13, %s1237_s13   ;;  %s801_s12 = sphi %s879_s12, %s1236_s12  }
  0x10   : > { %1210 = sst [smem:[#allocation15_spill]] %s833_s20  ;;  %s31_s27 = sadd.s32 1, %s845_s23 }
  0x11   : > { %1211 = sst [smem:[#allocation16_spill]] %s845_s23  ;;  %p32_p0 = scmp.ge.s32.totalorder %s31_s27, 3 }
  0x12   : > { %s34_s28 = sadd.s32 1, %s849_s24  ;;  %s43_s29 = sadd.s32 1, %s833_s20 }
  0x13   : > { %p50_p1 = scmp.ne.s32.totalorder %s833_s20, %s829_s19  ;;  %s1246_s27 = smov (%p32_p0, %s31_s27), 0 }
  0x14   : > { %1212 = sst [smem:[#allocation17_spill]] %s1246_s27  ;;  %s1248_s28 = smov (!%p32_p0, %s34_s28), %s849_s24 }
  0x15   : > { %s38_s30 = ssub.s32 %s845_s23, %s1246_s27  ;;  %p51_p2 = scmp.eq.s32.totalorder %s853_s25, 0 }
  0x16   : > { %p36_p3 = scmp.ge.s32.totalorder %s1248_s28, 2  ;;  %p56_p4 = scmp.ne.s32.totalorder %s829_s19, %s825_s18 }
  0x17   : > { %p964_p5 = por %p51_p2, %p50_p1  ;;  %p57_p6 = scmp.eq.s32.totalorder %s948_s26, 0 }
  0x18   : > { %s1250_s28 = smov (%p36_p3, %s1248_s28), 0  ;;  %p67_p8 = scmp.eq.s32.totalorder %s38_s30, 0 }
  0x19   : > { %1214 = sst [smem:[#allocation18_spill]] %s1250_s28  ;;  %p973_p7 = por %p57_p6, %p56_p4 }
  0x1a   : > { %s979_s6 = ssub.s32 %s849_s24, %s1250_s28  ;;  %s69_s7 = sadd.s32 1, %s821_s17 }
  0x1b   : > { %s40_s8 = sor.u32 %s979_s6, %s38_s30  ;;  %p76_p9 = scmp.ne.s32.totalorder %s821_s17, %s817_s16 }
  0x1c   : > { %p41_p10 = scmp.eq.s32.totalorder %s40_s8, 0  ;;  %p82_p11 = scmp.ne.s32.totalorder %s817_s16, %s813_s15 }
  0x1d   : > { %s988_s9 = scalar_select %p67_p8, %s821_s17, %s69_s7  }
  0x1e   : > { %s991_s10 = scalar_select %p41_p10, %s833_s20, %s43_s29  }
  0x1f   : > { %1216 = sst [smem:[#allocation19_spill]] %s988_s9  ;;  %p995_p12 = por %p76_p9, %p51_p2 }
  0x20   : > { %1217 = sst [smem:[#allocation20_spill]] %s991_s10  ;;  %p1001_p13 = por %p82_p11, %p57_p6 }
  0x21   : > { %p93_p0 = scmp.eq.s32.totalorder %s979_s6, 0  ;;  %p1206_p1 = scmp.lt.s32.totalorder %s853_s25, 6 }
  0x22   : > { %s468_s15 = sshll.u32 %s845_s23, 5  ;;  %s182_s30 = sand.u32 1, %s853_s25  }
  0x23   : > { %s184_s29 = sand.u32 1, %s821_s17   ;;  %p1014_p3 = pnand %p1206_p1, %p964_p5 }
  0x24   : > { %s1221_s1 = sld [smem:[#allocation21_spill]]  ;;  %s185_s9 = scalar_lea.vmem [#allocation6], %s184_s29 }
  0x25   : > { %s192_s3 = sshll.u32 %s185_s9, 4  ;;  %p481_p4 = pnand %p1206_p1, %p995_p12  ;;  %s193_s3 = int_to_ptr.vmem [resolvable:$true] %s192_s3 }
  0x26   : > { %p462_p8 = scmp.ge.s32.totalorder %s853_s25, 1  ;;  %p214_p9 = scmp.lt.s32.totalorder %s853_s25, 7 }
  0x27   : > { %s1028_s4 = scalar_lea.sflag [#allocation7], %s182_s30  ;;  %s167_s28 = sadd.s32 %s849_s24, %s468_s15 }
  0x28   : > { %p1031_p5 = pnand %p462_p8, %p214_p9  ;;  %s461_s11 = sshll.u32 %s167_s28, 3 }
  0x29   : > { %s857_s28 = smov 8   ;;  %s455_s29 = sadd.s32 4294967294, %s853_s25  }
  0x2a   : > { %s188_s27 = scalar_lea.hbm %s1221_s1, %s845_s23  ;;  %s855_s23 = smov 256  }
  0x2b   : > { %s190_s10 = sshll.u32 %s188_s27, 4  ;;  %s158_s27 = sand.u32 1, %s833_s20   ;;  %s191_s10 = int_to_ptr.hbm [resolvable:$true] %s190_s10 }
  0x2c   : > { %483 = dma.hbm_to_vmem [thread:$0]  (!%p481_p4), %s191_s10, 16, %s193_s3, %s1028_s4  }
  0x2d   : > { %s458_s9 = sshll.u32 %s158_s27, 7  ;;  %s169_s3 = scalar_lea.hbm %s1196_s0, %s461_s11 }
  0x2e   : > { %s162_s10 = scalar_lea.vmem [#allocation3], %s458_s9  ;;  %s170_s1 = sshll.u32 %s169_s3, 4  ;;  %s171_s1 = int_to_ptr.hbm [resolvable:$true] %s170_s1 }
  0x2f   : > { %s172_s8 = sshll.u32 %s162_s10, 4  ;;  %s159_s15 = scalar_lea.sflag [#allocation4], %s158_s27  ;;  %s173_s8 = int_to_ptr.vmem [resolvable:$true] %s172_s8 }
  0x30   : > { %s856_s20 = smov 128   ;;  %s95_s30 = sadd.s32 1, %s809_s14 }
  0x31   : > { %480 = dma.hbm_to_vmem [thread:$0]  (!%p1014_p3), %s171_s1, 2048, %s173_s8, %s159_s15, %s855_s23, %s856_s20, %s857_s28  }
  0x32   : > { %s1047_s11 = scalar_select %p93_p0, %s809_s14, %s95_s30  }
  0x33   : > { %p102_p10 = scmp.ne.s32.totalorder %s809_s14, %s805_s13  ;;  %p108_p11 = scmp.ne.s32.totalorder %s805_s13, %s801_s12 }
  0x34   : > { %p132_p12 = scmp.eq.s32.totalorder %s948_s26, 5  ;;  %p138_p4 = scmp.eq.s32.totalorder %s455_s29, 5 }
  0x35   : > { %p104_p8 = por %p102_p10, %p51_p2  ;;  %p1058_p9 = por %p108_p11, %p57_p6 }
  0x36   : > { %p1062_p1 = por %p132_p12, %p102_p10  ;;  %p1066_p3 = por %p138_p4, %p108_p11 }
  0x37   : > { %s201_s23 = sand.u32 1, %s809_s14   ;;  %s205_s9 = scalar_lea.hbm %s1198_s2, %s849_s24 }
  0x38   : > { %s207_s3 = sshll.u32 %s205_s9, 4  ;;  %s202_s10 = scalar_lea.vmem [#allocation8], %s201_s23  ;;  %s208_s3 = int_to_ptr.hbm [resolvable:$true] %s207_s3 }
  0x39   : > { %s209_s8 = sshll.u32 %s202_s10, 4  ;;  %p1226_p2 = scmp.lt.s32.totalorder %s853_s25, 6  ;;  %s210_s8 = int_to_ptr.vmem [resolvable:$true] %s209_s8 }
  0x3a   : > { %218 = sbr.rel (%p1031_p5) target bundleno = 270 (0x10e), region = 32  ;;  %s220_s15 = sand.u32 (!%p1031_p5), 1, %s829_s19  }
  0x3b   : > { %p484_p6 = pnand %p1226_p2, %p104_p8  ;;  %s463_s28 = sshll.u32 (!%p1031_p5), %s220_s15, 7 }
  0x3c   : > { %s221_s29 = scalar_lea.sflag (!%p1031_p5), [#allocation4], %s220_s15  ;;  %s1081_s30 = scalar_lea.vmem (!%p1031_p5), [#allocation3], %s463_s28 }
  0x3d   : > { %486 = dma.hbm_to_vmem [thread:$0]  (!%p484_p6), %s208_s3, 16, %s210_s8, %s1028_s4  }
  0x3f   : > { %784 = dma.done.wait (%p973_p7), %s221_s29, 2048  }
  0x40   : > { %786 = vsyncadd (%p973_p7), %s221_s29, 4294965248  ;;  %s230_s23 = sand.u32 1, %s948_s26   ;;  %s232_s4 = sand.u32 1, %s817_s16  }
  0x41   : > { %s231_s6 = scalar_lea.sflag [#allocation7], %s230_s23  ;;  %s1089_s17 = scalar_lea.vmem [#allocation6], %s232_s4 }
  0x42   : > { %788 = dma.done.wait (%p1001_p13), %s231_s6, 16  }
  0x43   : > { %790 = vsyncadd (%p1001_p13), %s231_s6, 4294967280  ;;  %s1096_s7 = sand.u32 1, %s805_s13  }
  0x44   : > { %s242_s5 = scalar_lea.vmem [#allocation8], %s1096_s7 }
  0x45   : > { %792 = dma.done.wait (%p1058_p9), %s231_s6, 16  }
  0x46   : > { %794 = vsyncadd (%p1058_p9), %s231_s6, 4294967280  ;;  %s272_s26 = scalar_lea.vmem [#allocation9], %s1096_s7  ;;  %p464_p7 = scmp.ne.s32.totalorder %s837_s21, 0 }
  0x48   : > { %277 = sbr.rel (%p464_p7) target bundleno = 79 (0x4f), region = 48 }
  0x4d   : > { %v858_v0 = vmov 0.0  }
  0x4e   : > { %278 = vst [vmem:[#allocation2] sm:$0x1] %v858_v0 }
  0x4f PF: > { %v296_v1 = vld [vmem:[%s1081_s30 + $0x78] sm:$0xff]  ;;  %v295_v2 = vld [vmem:[%s1081_s30 + $0x70] sm:$0xff]  ;;  %v294_v3 = vld [vmem:[%s1081_s30 + $0x68] sm:$0xff]  ;;  %p465_p13 = scmp.ne.s32.totalorder %s837_s21, 2 }
  0x50   : > { %297 = vmatpush.msra.mxu0 %v296_v1  ;;  %v293_v4 = vld [vmem:[%s1081_s30 + $0x60] sm:$0xff]  ;;  %v292_v5 = vld [vmem:[%s1081_s30 + $0x58] sm:$0xff]  ;;  %v291_v6 = vld [vmem:[%s1081_s30 + $0x50] sm:$0xff] }
  0x51   : > { %v290_v7 = vld [vmem:[%s1081_s30 + $0x48] sm:$0xff]  ;;  %v289_v8 = vld [vmem:[%s1081_s30 + $0x40] sm:$0xff]  ;;  %v288_v9 = vld [vmem:[%s1081_s30 + $0x38] sm:$0xff] }
  0x52   : > { %298 = vmatpush.msra.mxu0 %v295_v2  ;;  %v287_v10 = vld [vmem:[%s1081_s30 + $0x30] sm:$0xff]  ;;  %v286_v11 = vld [vmem:[%s1081_s30 + $0x28] sm:$0xff]  ;;  %v285_v12 = vld [vmem:[%s1081_s30 + $0x20] sm:$0xff] }
  0x53   : > { %v284_v13 = vld [vmem:[%s1081_s30 + $0x18] sm:$0xff]  ;;  %v283_v14 = vld [vmem:[%s1081_s30 + $0x10] sm:$0xff]  ;;  %v282_v15 = vld [vmem:[%s1081_s30 + $0x8] sm:$0xff] }
  0x54   : > { %299 = vmatpush.msra.mxu0 %v294_v3  ;;  %v281_v16 = vld [vmem:[%s1081_s30] sm:$0xff]  ;;  %v280_v17 = vld [vmem:[%s1089_s17] sm:$0x1] }
  0x55   : > { %v279_v18 = vld [vmem:[#allocation2] sm:$0x1] }
  0x56   : > { %300 = vmatpush.msra.mxu0 %v293_v4 }
  0x58   : > { %301 = vmatpush.msra.mxu0 %v292_v5 }
  0x5a   : > { %302 = vmatpush.msra.mxu0 %v291_v6 }
  0x5c   : > { %303 = vmatpush.msra.mxu0 %v290_v7 }
  0x5e   : > { %304 = vmatpush.msra.mxu0 %v289_v8 }
  0x60   : > { %305 = vmatpush.msra.mxu0 %v288_v9 }
  0x62   : > { %306 = vmatpush.msra.mxu0 %v287_v10 }
  0x64   : > { %307 = vmatpush.msra.mxu0 %v286_v11 }
  0x66   : > { %308 = vmatpush.msra.mxu0 %v285_v12 }
  0x68   : > { %309 = vmatpush.msra.mxu0 %v284_v13 }
  0x6a   : > { %310 = vmatpush.msra.mxu0 %v283_v14 }
  0x6c   : > { %311 = vmatpush.msra.mxu0 %v282_v15 }
  0x6e   : > { %312 = vmatpush.msra.mxu0 %v281_v16 }
  0x6f   : > { %313 = vmatmul.f32.vlgmr.msra.gmra.mxu0 %v280_v17 }
  0xeb   : > { %322 = sbr.rel (%p465_p13) target bundleno = 250 (0xfa), region = 52 }
  0xec   : > { %v314_v19 = vpop.f32.mrf.mxu0 }
  0xed   : > { %v317_v20 = vadd.f32 %v314_v19, %v279_v18 }
  0xef   : > { %318 = vst [vmem:[#allocation2] sm:$0x1] %v317_v20 }
  0xf0   : > { %v324_v22 = vld [vmem:[%s242_s5] sm:$0x1] }
  0xf6   : > { %v323_v21 = vld [vmem:[#allocation2] sm:$0x1] }
  0xf7   : > { %v325_v23 = vadd.f32 %v324_v22, %v323_v21 }
  0xf9   : > { %326 = vst [vmem:[%s272_s26] sm:$0x1] %v325_v23 }
  0xfa PF: > { %s1227_s9 = sld [smem:[#allocation22_spill]]  ;;  %s338_s21 = sshll.u32 %s272_s26, 4  ;;  %s339_s21 = int_to_ptr.vmem [resolvable:$true] %s338_s21 }
  0xfb   : > { %s328_s8 = scalar_lea.sflag [#allocation5], %s1096_s7 }
 0x100   : > { %s336_s3 = scalar_lea.hbm %s1227_s9, %s841_s22  ;;  %s719_s23 = scalar_lea.hbm %s1227_s9, 2 }
 0x101   : > { %s340_s10 = sshll.u32 %s336_s3, 4  ;;  %s341_s10 = int_to_ptr.hbm [resolvable:$true] %s340_s10 }
 0x102   : > { %s713_s15 = sshra.s32 %s341_s10, 4  ;;  %s714_s15 = int_to_ptr.hbm [resolvable:$true] %s713_s15 }
 0x103   : > { %s715_s28 = scalar_lea.hbm %s714_s15, 1  ;;  %p720_p11 = scmp.lt.s32.totalorder %s714_s15, %s1227_s9 }
 0x104   : > { %p716_p0 = scmp.ne.s32.totalorder %s714_s15, %s715_s28  ;;  %p721_p12 = scmp.lt.s32.totalorder %s719_s23, %s715_s28 }
 0x106   : > { %p717_p5 = pnand %p716_p0, %p1062_p1  ;;  %p722_p4 = por %p721_p12, %p720_p11 }
 0x108   : > { %p718_p10 = pneg %p717_p5 }
 0x10a   : > { %p723_p8 = pnand %p722_p4, %p718_p10 }
 0x10c   : > { %726 = shalt.err (!%p723_p8)
}
 0x10d   : > { %475 = dma.vmem_to_hbm [thread:$0]  (%p1062_p1), %s339_s21, 16, %s341_s10, %s328_s8  }
 0x10e PF: > { %p492_p9 = scmp.ge.s32.totalorder %s853_s25, 2  ;;  %s352_s22 = sand.u32 1, %s801_s12  }
 0x10f   : > { %s353_s17 = scalar_lea.sflag [#allocation5], %s352_s22 }
 0x110   : > { %p488_p2 = pnand %p492_p9, %p1066_p3 }
 0x112   : > { %p489_p6 = pneg %p488_p2 }
 0x114   : > { %796 = dma.done.wait (%p489_p6), %s353_s17, 16  }
 0x115   : > { %798 = vsyncadd (%p489_p6), %s353_s17, 4294967280  ;;  %s22_s25 = sadd.s32 1, %s853_s25   ;;  %s1229_s1 = sld [smem:[#allocation14_spill]] }
 0x116   : > { %p1149_p7 = scmp.ge.s32.totalorder %s22_s25, 8   ;;  %s1230_s17 = sld [smem:[#allocation19_spill]] }
 0x117   : > { %s1231_s5 = sld [smem:[#allocation15_spill]]  ;;  %s1236_s12 = smov %s805_s13 }
 0x118   : > { %s1232_s20 = sld [smem:[#allocation20_spill]]  ;;  %s1237_s13 = smov %s809_s14 }
 0x119   : > { %s1233_s21 = sld [smem:[#allocation16_spill]]  ;;  %s1238_s14 = smov %s1047_s11 }
 0x11a   : > { %s1234_s23 = sld [smem:[#allocation17_spill]]  ;;  %s1239_s15 = smov %s817_s16 }
 0x11b   : > { %s1235_s26 = sld [smem:[#allocation18_spill]]  ;;  %s1240_s16 = smov %s1229_s1 }
 0x11c   : > { %s1241_s18 = smov %s829_s19  ;;  %s1243_s22 = smov %s849_s24 }
 0x11d   : > { %s1242_s19 = smov %s1231_s5  ;;  %21 = sbr.rel (!%p1149_p7) target bundleno = 15 (0xf), region = 109 }
 0x121   : > { %s1244_s24 = smov %s1235_s26 }
 0x122   :  { %358 = vsyncpa [#allocation4], 1 }
 0x123   :  { %360 = vsyncpa [#allocation4 + $0x1], 1 }
 0x124   :  { %361 = vsyncpa [#allocation7], 1 }
 0x125   :  { %363 = vsyncpa [#allocation7 + $0x1], 1 }
 0x126   :  { %364 = vsyncpa [#allocation5], 1 }
 0x127   :  { %366 = vsyncpa [#allocation5 + $0x1], 1 }

</bundles_post_ra>
